<compile_context>
chip_gen: v6e
topology: v6e:2x2x1
jax: 0.10.0
libtpu: 0.0.40
codegen_flags: <defaults>
</compile_context>

<pallas_src>
import functools

import jax
import jax.numpy as jnp
from jax.experimental import pallas as pl
from jax.experimental.pallas import tpu as pltpu

HIDDEN = 256              # hardcoded in the PyTorch module
MAX_BATCH_TILE = 2048     # rows per grid step (sized for v7x's 64 MiB VMEM too)
VMEM_LIMIT_BYTES = 48 << 20


def _critic_kernel(sa_ref,
                   w14_ref, b14_ref,
                   w2_ref, b2_ref, w5_ref, b5_ref,
                   w36t_ref, w36b_ref, b36_ref,
                   q_ref, *, compute_dtype):
    cd = compute_dtype
    sa = sa_ref[...].astype(cd)                                   # (TB, S+A)

    # ---- layer 1, both Q heads fused into one K=(S+A) matmul -> (TB, 512) ----
    h = jnp.dot(sa, w14_ref[...], preferred_element_type=jnp.float32)
    h = jnp.maximum(h + b14_ref[...], 0.0)                        # bias+ReLU in f32

    h1 = h[:, :HIDDEN].astype(cd)                                 # Q1 activations
    h2 = h[:, HIDDEN:].astype(cd)                                 # Q2 activations

    # ---- layer 2, per head (block-diag here would double FLOPs) ----
    h1 = jnp.maximum(
        jnp.dot(h1, w2_ref[...], preferred_element_type=jnp.float32) + b2_ref[...],
        0.0)
    h2 = jnp.maximum(
        jnp.dot(h2, w5_ref[...], preferred_element_type=jnp.float32) + b5_ref[...],
        0.0)

    # ---- merged output heads, no (TB,512) concat: w36t col0=w3, w36b col1=w6 ----
    q = (jnp.dot(h1.astype(cd), w36t_ref[...], preferred_element_type=jnp.float32)
         + jnp.dot(h2.astype(cd), w36b_ref[...], preferred_element_type=jnp.float32)
         + b36_ref[...])
    q_ref[...] = q.astype(q_ref.dtype)


def pack_params(params, compute_dtype=jnp.bfloat16):
    """Pre-pack raw per-layer params into the fused layout the kernel expects."""
    cd = compute_dtype
    f32 = jnp.float32
    w14 = jnp.concatenate([params["w1"], params["w4"]], axis=1)       # (S+A, 512)
    b14 = jnp.concatenate([params["b1"], params["b4"]], axis=1)       # (1, 512)
    zcol = jnp.zeros((HIDDEN, 1), f32)
    w36t = jnp.concatenate([params["w3"], zcol], axis=1)              # (256, 2): [w3 | 0]
    w36b = jnp.concatenate([zcol, params["w6"]], axis=1)              # (256, 2): [0 | w6]
    b36 = jnp.concatenate([params["b3"], params["b6"]], axis=1)       # (1, 2)
    return {
        "w14": w14.astype(cd), "b14": b14.astype(f32),
        "w2": params["w2"].astype(cd), "b2": params["b2"].astype(f32),
        "w5": params["w5"].astype(cd), "b5": params["b5"].astype(f32),
        "w36t": w36t.astype(cd), "w36b": w36b.astype(cd),
        "b36": b36.astype(f32),
    }


def critic_forward(state, action, packed, *,
                   max_batch_tile=MAX_BATCH_TILE, compute_dtype=jnp.bfloat16):
    """Pallas implementation of Critic.forward -> (q1, q2), each (B, 1) f32."""
    B = state.shape[0]
    # Single (B, S+A) input: one DMA stream, one K=(S+A) layer-1 matmul.  The
    # wrapper-side concat is ~B*(S+A)*4 bytes, negligible.
    sa = jnp.concatenate([state, action], axis=1)
    sa_dim = sa.shape[1]

    # Adaptive batch tiling: >= 2 grid steps (v7x megacore), 8-aligned rows,
    # padding waste < 8 rows per step.
    num_steps = max(2, pl.cdiv(B, max_batch_tile))
    tb = ((pl.cdiv(B, num_steps) + 7) // 8) * 8
    bp = num_steps * tb
    if bp != B:
        sa = jnp.pad(sa, ((0, bp - B), (0, 0)))
    grid = (num_steps,)

    weights = (packed["w14"], packed["b14"],
               packed["w2"], packed["b2"], packed["w5"], packed["b5"],
               packed["w36t"], packed["w36b"], packed["b36"])
    args = (sa,) + weights

    def resident(x):
        # Full-array block, constant index_map -> stays in VMEM across steps.
        return pl.BlockSpec(x.shape, lambda i: (0, 0))

    in_specs = ([pl.BlockSpec((tb, sa_dim), lambda i: (i, 0))]
                + [resident(w) for w in weights])
    out_specs = pl.BlockSpec((tb, 2), lambda i: (i, 0))

    flops = 2 * bp * (sa_dim * 2 * HIDDEN          # fused layer 1
                      + 2 * HIDDEN * HIDDEN        # two 256x256 layer-2 matmuls
                      + 2 * HIDDEN * 2)            # two (256,2) output matmuls
    bytes_accessed = (sum(int(x.size) * x.dtype.itemsize for x in args)
                      + bp * 2 * 4)

    q = pl.pallas_call(
        functools.partial(_critic_kernel, compute_dtype=compute_dtype),
        grid=grid,
        in_specs=in_specs,
        out_specs=out_specs,
        out_shape=jax.ShapeDtypeStruct((bp, 2), jnp.float32),
        compiler_params=pltpu.CompilerParams(
            dimension_semantics=("parallel",),
            vmem_limit_bytes=VMEM_LIMIT_BYTES),
        cost_estimate=pl.CostEstimate(
            flops=flops, transcendentals=0, bytes_accessed=bytes_accessed),
    )(*args)

    q1 = q[:B, 0:1]
    q2 = q[:B, 1:2]
    return q1, q2


def critic_q1(state, action, packed, **kw):
    """Equivalent of Critic.Q1: the q1 head (shares the fused forward)."""
    return critic_forward(state, action, packed, **kw)[0]


def init_params(key, state_dim, action_dim):
    """Deterministic init matching PyTorch nn.Linear: U(+-1/sqrt(fan_in)) for
    both weight and bias, fan_in = in_features of that layer."""
    in_dim = state_dim + action_dim
    shapes = {
        "w1": (in_dim, HIDDEN), "b1": (1, HIDDEN),
        "w2": (HIDDEN, HIDDEN), "b2": (1, HIDDEN),
        "w3": (HIDDEN, 1),      "b3": (1, 1),
        "w4": (in_dim, HIDDEN), "b4": (1, HIDDEN),
        "w5": (HIDDEN, HIDDEN), "b5": (1, HIDDEN),
        "w6": (HIDDEN, 1),      "b6": (1, 1),
    }
    fan_in = {
        "w1": in_dim, "b1": in_dim, "w4": in_dim, "b4": in_dim,
        "w2": HIDDEN, "b2": HIDDEN, "w5": HIDDEN, "b5": HIDDEN,
        "w3": HIDDEN, "b3": HIDDEN, "w6": HIDDEN, "b6": HIDDEN,
    }
    names = sorted(shapes)
    keys = jax.random.split(key, len(names))
    params = {}
    for k, name in zip(keys, names):
        bound = 1.0 / (float(fan_in[name]) ** 0.5)
        params[name] = jax.random.uniform(
            k, shapes[name], dtype=jnp.float32, minval=-bound, maxval=bound)
    return params


def critic_reference(state, action, p):
    """Pure-JAX reference of the PyTorch forward for verification."""
    sa = jnp.concatenate([state, action], axis=1)
    h1 = jax.nn.relu(sa @ p["w1"] + p["b1"])
    h1 = jax.nn.relu(h1 @ p["w2"] + p["b2"])
    q1 = h1 @ p["w3"] + p["b3"]
    h2 = jax.nn.relu(sa @ p["w4"] + p["b4"])
    h2 = jax.nn.relu(h2 @ p["w5"] + p["b5"])
    q2 = h2 @ p["w6"] + p["b6"]
    return q1, q2


if __name__ == "__main__":
    state_dim, action_dim, batch = 12, 4, 2

    key = jax.random.PRNGKey(0)
    k_params, k_state, k_action = jax.random.split(key, 3)

    params = init_params(k_params, state_dim, action_dim)
    state = jax.random.normal(k_state, (batch, state_dim), dtype=jnp.float32)
    action = jax.random.normal(k_action, (batch, action_dim), dtype=jnp.float32)

    packed_f32 = pack_params(params, compute_dtype=jnp.float32)
    packed_bf16 = pack_params(params)                     # default: bf16 operands

    q1_ref, q2_ref = critic_reference(state, action, params)

    # --- f32 operand path (tight check vs reference), small batch ---
    q1, q2 = critic_forward(state, action, packed_f32, compute_dtype=jnp.float32)
    q1 = jax.block_until_ready(q1)
    q2 = jax.block_until_ready(q2)
    assert q1.shape == (batch, 1) and q2.shape == (batch, 1)
    assert jnp.allclose(q1, q1_ref, atol=1e-5, rtol=1e-5)
    assert jnp.allclose(q2, q2_ref, atol=1e-5, rtol=1e-5)

    # --- default bf16 MXU-operand path (f32 accumulation), looser tolerance ---
    q1b, q2b = critic_forward(state, action, packed_bf16)
    q1b = jax.block_until_ready(q1b)
    assert jnp.allclose(q1b, q1_ref, atol=5e-2, rtol=5e-2)
    assert jnp.allclose(q2b, q2_ref, atol=5e-2, rtol=5e-2)

    # --- ragged batch (exercises adaptive tiling + row padding, 2 grid steps) ---
    kr_s, kr_a = jax.random.split(jax.random.PRNGKey(1), 2)
    rag_b = 1000
    rag_state = jax.random.normal(kr_s, (rag_b, state_dim), dtype=jnp.float32)
    rag_action = jax.random.normal(kr_a, (rag_b, action_dim), dtype=jnp.float32)
    rq1, rq2 = critic_forward(rag_state, rag_action, packed_f32,
                              compute_dtype=jnp.float32)
    rq1 = jax.block_until_ready(rq1)
    rq1_ref, rq2_ref = critic_reference(rag_state, rag_action, params)
    assert rq1.shape == (rag_b, 1) and rq2.shape == (rag_b, 1)
    assert jnp.allclose(rq1, rq1_ref, atol=1e-4, rtol=1e-4)
    assert jnp.allclose(rq2, rq2_ref, atol=1e-4, rtol=1e-4)

    # --- larger batch on the default bf16 path ---
    kb_s, kb_a = jax.random.split(jax.random.PRNGKey(2), 2)
    big_b = 2304
    big_state = jax.random.normal(kb_s, (big_b, state_dim), dtype=jnp.float32)
    big_action = jax.random.normal(kb_a, (big_b, action_dim), dtype=jnp.float32)
    bq1, bq2 = critic_forward(big_state, big_action, packed_bf16)
    bq1 = jax.block_until_ready(bq1)
    bq1_ref, bq2_ref = critic_reference(big_state, big_action, params)
    assert bq1.shape == (big_b, 1) and bq2.shape == (big_b, 1)
    assert jnp.allclose(bq1, bq1_ref, atol=5e-2, rtol=5e-2)
    assert jnp.allclose(bq2, bq2_ref, atol=5e-2, rtol=5e-2)

    # --- Q1 method ---
    q1_only = jax.block_until_ready(critic_q1(state, action, packed_bf16))
    assert jnp.allclose(q1_only, q1_ref, atol=5e-2, rtol=5e-2)

    print("KERNEL_OK")
</pallas_src>

<mosaic_0001>
module attributes {stable_mosaic.version = 11 : i64} {
  func.func @_critic_kernel(%arg0: i32, %arg1: memref<8x16xf32, #tpu.memory_space<vmem>>, %arg2: memref<16x512xf32, #tpu.memory_space<vmem>>, %arg3: memref<1x512xf32, #tpu.memory_space<vmem>>, %arg4: memref<256x256xf32, #tpu.memory_space<vmem>>, %arg5: memref<1x256xf32, #tpu.memory_space<vmem>>, %arg6: memref<256x256xf32, #tpu.memory_space<vmem>>, %arg7: memref<1x256xf32, #tpu.memory_space<vmem>>, %arg8: memref<256x2xf32, #tpu.memory_space<vmem>>, %arg9: memref<256x2xf32, #tpu.memory_space<vmem>>, %arg10: memref<1x2xf32, #tpu.memory_space<vmem>>, %arg11: memref<8x2xf32, #tpu.memory_space<vmem>>) attributes {dimension_semantics = [#tpu.dimension_semantics<parallel>], iteration_bounds = array<i64: 2>, scalar_prefetch = 0 : i64, scratch_operands = 0 : i64, tpu.core_type = #tpu.core_type<tc>, window_params = [{transform_indices = @transform_0, window_bounds = array<i64: 8, 16>}, {pipeline_mode = #tpu.pipeline_mode<synchronous>, transform_indices = @transform_1, window_bounds = array<i64: 16, 512>}, {pipeline_mode = #tpu.pipeline_mode<synchronous>, transform_indices = @transform_2, window_bounds = array<i64: 1, 512>}, {pipeline_mode = #tpu.pipeline_mode<synchronous>, transform_indices = @transform_3, window_bounds = array<i64: 256, 256>}, {pipeline_mode = #tpu.pipeline_mode<synchronous>, transform_indices = @transform_4, window_bounds = array<i64: 1, 256>}, {pipeline_mode = #tpu.pipeline_mode<synchronous>, transform_indices = @transform_5, window_bounds = array<i64: 256, 256>}, {pipeline_mode = #tpu.pipeline_mode<synchronous>, transform_indices = @transform_6, window_bounds = array<i64: 1, 256>}, {pipeline_mode = #tpu.pipeline_mode<synchronous>, transform_indices = @transform_7, window_bounds = array<i64: 256, 2>}, {pipeline_mode = #tpu.pipeline_mode<synchronous>, transform_indices = @transform_8, window_bounds = array<i64: 256, 2>}, {pipeline_mode = #tpu.pipeline_mode<synchronous>, transform_indices = @transform_9, window_bounds = array<i64: 1, 2>}, {transform_indices = @transform_10, window_bounds = array<i64: 8, 2>}]} {
    %c0 = arith.constant 0 : index
    %c0_0 = arith.constant 0 : index
    %0 = vector.load %arg1[%c0, %c0_0] : memref<8x16xf32, #tpu.memory_space<vmem>>, vector<8x16xf32>
    %c0_1 = arith.constant 0 : index
    %c0_2 = arith.constant 0 : index
    %1 = vector.load %arg2[%c0_1, %c0_2] : memref<16x512xf32, #tpu.memory_space<vmem>>, vector<16x512xf32>
    %cst = arith.constant dense<0.000000e+00> : vector<8x512xf32>
    %2 = tpu.matmul %0, %1, %cst {dimension_numbers = #tpu.dot_dimension_numbers<[1], [0], [0], [1], [0, 0, 1, 1], [], []>} : vector<8x16xf32>, vector<16x512xf32>, vector<8x512xf32> -> vector<8x512xf32>
    %c0_3 = arith.constant 0 : index
    %c0_4 = arith.constant 0 : index
    %3 = vector.load %arg3[%c0_3, %c0_4] : memref<1x512xf32, #tpu.memory_space<vmem>>, vector<1x512xf32>
    %4 = vector.broadcast %3 : vector<1x512xf32> to vector<8x512xf32>
    %5 = arith.addf %2, %4 : vector<8x512xf32>
    %cst_5 = arith.constant 0.000000e+00 : f32
    %6 = vector.broadcast %cst_5 : f32 to vector<8x512xf32>
    %7 = arith.maximumf %5, %6 : vector<8x512xf32>
    %8 = vector.extract_strided_slice %7 {offsets = [0, 0], sizes = [8, 256], strides = [1, 1]} : vector<8x512xf32> to vector<8x256xf32>
    %9 = vector.extract_strided_slice %7 {offsets = [0, 256], sizes = [8, 256], strides = [1, 1]} : vector<8x512xf32> to vector<8x256xf32>
    %c0_6 = arith.constant 0 : index
    %c0_7 = arith.constant 0 : index
    %10 = vector.load %arg4[%c0_6, %c0_7] : memref<256x256xf32, #tpu.memory_space<vmem>>, vector<256x256xf32>
    %cst_8 = arith.constant dense<0.000000e+00> : vector<8x256xf32>
    %11 = tpu.matmul %8, %10, %cst_8 {dimension_numbers = #tpu.dot_dimension_numbers<[1], [0], [0], [1], [0, 0, 1, 1], [], []>} : vector<8x256xf32>, vector<256x256xf32>, vector<8x256xf32> -> vector<8x256xf32>
    %c0_9 = arith.constant 0 : index
    %c0_10 = arith.constant 0 : index
    %12 = vector.load %arg5[%c0_9, %c0_10] : memref<1x256xf32, #tpu.memory_space<vmem>>, vector<1x256xf32>
    %13 = vector.broadcast %12 : vector<1x256xf32> to vector<8x256xf32>
    %14 = arith.addf %11, %13 : vector<8x256xf32>
    %cst_11 = arith.constant 0.000000e+00 : f32
    %15 = vector.broadcast %cst_11 : f32 to vector<8x256xf32>
    %16 = arith.maximumf %14, %15 : vector<8x256xf32>
    %c0_12 = arith.constant 0 : index
    %c0_13 = arith.constant 0 : index
    %17 = vector.load %arg6[%c0_12, %c0_13] : memref<256x256xf32, #tpu.memory_space<vmem>>, vector<256x256xf32>
    %cst_14 = arith.constant dense<0.000000e+00> : vector<8x256xf32>
    %18 = tpu.matmul %9, %17, %cst_14 {dimension_numbers = #tpu.dot_dimension_numbers<[1], [0], [0], [1], [0, 0, 1, 1], [], []>} : vector<8x256xf32>, vector<256x256xf32>, vector<8x256xf32> -> vector<8x256xf32>
    %c0_15 = arith.constant 0 : index
    %c0_16 = arith.constant 0 : index
    %19 = vector.load %arg7[%c0_15, %c0_16] : memref<1x256xf32, #tpu.memory_space<vmem>>, vector<1x256xf32>
    %20 = vector.broadcast %19 : vector<1x256xf32> to vector<8x256xf32>
    %21 = arith.addf %18, %20 : vector<8x256xf32>
    %cst_17 = arith.constant 0.000000e+00 : f32
    %22 = vector.broadcast %cst_17 : f32 to vector<8x256xf32>
    %23 = arith.maximumf %21, %22 : vector<8x256xf32>
    %c0_18 = arith.constant 0 : index
    %c0_19 = arith.constant 0 : index
    %24 = vector.load %arg8[%c0_18, %c0_19] : memref<256x2xf32, #tpu.memory_space<vmem>>, vector<256x2xf32>
    %cst_20 = arith.constant dense<0.000000e+00> : vector<8x2xf32>
    %25 = tpu.matmul %16, %24, %cst_20 {dimension_numbers = #tpu.dot_dimension_numbers<[1], [0], [0], [1], [0, 0, 1, 1], [], []>} : vector<8x256xf32>, vector<256x2xf32>, vector<8x2xf32> -> vector<8x2xf32>
    %c0_21 = arith.constant 0 : index
    %c0_22 = arith.constant 0 : index
    %26 = vector.load %arg9[%c0_21, %c0_22] : memref<256x2xf32, #tpu.memory_space<vmem>>, vector<256x2xf32>
    %cst_23 = arith.constant dense<0.000000e+00> : vector<8x2xf32>
    %27 = tpu.matmul %23, %26, %cst_23 {dimension_numbers = #tpu.dot_dimension_numbers<[1], [0], [0], [1], [0, 0, 1, 1], [], []>} : vector<8x256xf32>, vector<256x2xf32>, vector<8x2xf32> -> vector<8x2xf32>
    %28 = arith.addf %25, %27 : vector<8x2xf32>
    %c0_24 = arith.constant 0 : index
    %c0_25 = arith.constant 0 : index
    %29 = vector.load %arg10[%c0_24, %c0_25] : memref<1x2xf32, #tpu.memory_space<vmem>>, vector<1x2xf32>
    %30 = vector.broadcast %29 : vector<1x2xf32> to vector<8x2xf32>
    %31 = arith.addf %28, %30 : vector<8x2xf32>
    %c0_26 = arith.constant 0 : index
    %c0_27 = arith.constant 0 : index
    %32 = vector.load %arg11[%c0_26, %c0_27] : memref<8x2xf32, #tpu.memory_space<vmem>>, vector<8x2xf32>
    tpu.vector_store %arg11[%c0_26, %c0_27], %31 {strides = array<i32>} : memref<8x2xf32, #tpu.memory_space<vmem>>, vector<8x2xf32>,
    return
  }
  func.func @transform_0(%arg0: i32) -> (i32, i32) {
    %c0_i32 = arith.constant 0 : i32
    %c0_i32_0 = arith.constant 0 : i32
    return %arg0, %c0_i32 : i32, i32
  }
  func.func @transform_1(%arg0: i32) -> (i32, i32) {
    %c0_i32 = arith.constant 0 : i32
    %c0_i32_0 = arith.constant 0 : i32
    %c0_i32_1 = arith.constant 0 : i32
    return %c0_i32, %c0_i32_0 : i32, i32
  }
  func.func @transform_2(%arg0: i32) -> (i32, i32) {
    %c0_i32 = arith.constant 0 : i32
    %c0_i32_0 = arith.constant 0 : i32
    %c0_i32_1 = arith.constant 0 : i32
    return %c0_i32, %c0_i32_0 : i32, i32
  }
  func.func @transform_3(%arg0: i32) -> (i32, i32) {
    %c0_i32 = arith.constant 0 : i32
    %c0_i32_0 = arith.constant 0 : i32
    %c0_i32_1 = arith.constant 0 : i32
    return %c0_i32, %c0_i32_0 : i32, i32
  }
  func.func @transform_4(%arg0: i32) -> (i32, i32) {
    %c0_i32 = arith.constant 0 : i32
    %c0_i32_0 = arith.constant 0 : i32
    %c0_i32_1 = arith.constant 0 : i32
    return %c0_i32, %c0_i32_0 : i32, i32
  }
  func.func @transform_5(%arg0: i32) -> (i32, i32) {
    %c0_i32 = arith.constant 0 : i32
    %c0_i32_0 = arith.constant 0 : i32
    %c0_i32_1 = arith.constant 0 : i32
    return %c0_i32, %c0_i32_0 : i32, i32
  }
  func.func @transform_6(%arg0: i32) -> (i32, i32) {
    %c0_i32 = arith.constant 0 : i32
    %c0_i32_0 = arith.constant 0 : i32
    %c0_i32_1 = arith.constant 0 : i32
    return %c0_i32, %c0_i32_0 : i32, i32
  }
  func.func @transform_7(%arg0: i32) -> (i32, i32) {
    %c0_i32 = arith.constant 0 : i32
    %c0_i32_0 = arith.constant 0 : i32
    %c0_i32_1 = arith.constant 0 : i32
    return %c0_i32, %c0_i32_0 : i32, i32
  }
  func.func @transform_8(%arg0: i32) -> (i32, i32) {
    %c0_i32 = arith.constant 0 : i32
    %c0_i32_0 = arith.constant 0 : i32
    %c0_i32_1 = arith.constant 0 : i32
    return %c0_i32, %c0_i32_0 : i32, i32
  }
  func.func @transform_9(%arg0: i32) -> (i32, i32) {
    %c0_i32 = arith.constant 0 : i32
    %c0_i32_0 = arith.constant 0 : i32
    %c0_i32_1 = arith.constant 0 : i32
    return %c0_i32, %c0_i32_0 : i32, i32
  }
  func.func @transform_10(%arg0: i32) -> (i32, i32) {
    %c0_i32 = arith.constant 0 : i32
    %c0_i32_0 = arith.constant 0 : i32
    return %arg0, %c0_i32 : i32, i32
  }
}

</mosaic_0001>

<bundles_post_ra>
// kernel: tpu_custom_call.1
= control target key start
LH: loop header
LB: loop body
LE: loop exit
PB: predicated region body
PF: predicated region fallthrough
CT: control target
= control target key end

     0   :  { %s2050_s0 = inlined_call_operand.hbm [shape: f32[16,16], index: 0, kind: input, shape index: {}]   ;;  %s2051_s1 = inlined_call_operand.hbm [shape: f32[16,512], index: 1, kind: input, shape index: {}]   ;;  %s2052_s2 = inlined_call_operand.vmem [shape: f32[1,512], index: 2, kind: input, shape index: {}]   ;;  %s2053_s3 = inlined_call_operand.vmem [shape: f32[256,256], index: 3, kind: input, shape index: {}]   ;;  %s2054_s4 = inlined_call_operand.vmem [shape: f32[1,256], index: 4, kind: input, shape index: {}]   ;;  %s2055_s5 = inlined_call_operand.hbm [shape: f32[256,256], index: 5, kind: input, shape index: {}]   ;;  %s2056_s6 = inlined_call_operand.vmem [shape: f32[1,256], index: 6, kind: input, shape index: {}]   ;;  %s2057_s7 = inlined_call_operand.vmem [shape: f32[256,2], index: 7, kind: input, shape index: {}]   ;;  %s2058_s8 = inlined_call_operand.vmem [shape: f32[256,2], index: 8, kind: input, shape index: {}]   ;;  %s2059_s9 = inlined_call_operand.vmem [shape: f32[1,2], index: 9, kind: input, shape index: {}]   ;;  %s2060_s10 = inlined_call_operand.vmem [shape: f32[16,2], index: 10, kind: output, shape index: {}]  }
   0x1   :  { %2064 = sst [smem:[#allocation9_spill]] %s2051_s1 }
   0x2   :  { %15 = vsyncpa [#allocation3], 0 }
   0x3   :  { %17 = vsyncpa [#allocation3 + $0x1], 0 }
   0x4   :  { %18 = vsyncpa [#allocation5], 0  ;;  %s1516_s13 = smov 0   ;;  %s1518_s14 = smov 0  }
   0x5   :  { %s1520_s15 = smov 0   ;;  %s1522_s16 = smov 0  }
   0x6 LB: > { %s1535_s17 = sadd.s32 4294967295, %s1451_s16   ;;  %p44_p0 = scmp.ne.s32.totalorder %s1443_s14, %s1439_s13  ;;  %s1451_s16 = sphi %s1522_s16, %s2077_s16   ;;  %s1447_s15 = sphi %s1520_s15, %s2076_s15   ;;  %s1443_s14 = sphi %s1518_s14, %s2075_s14   ;;  %s1439_s13 = sphi %s1516_s13, %s2074_s13  }
   0x7   : > { %p2061_p1 = scmp.eq.s32.totalorder %s1535_s17, 0  ;;  %p1182_p2 = scmp.ge.s32.totalorder %s1451_s16, 1 }
   0x8   : > { %p270_p3 = scmp.lt.s32.totalorder %s1451_s16, 3  ;;  %s1453_s20 = smov [#allocation4]  }
   0x9   : > { %p1543_p4 = por %p2061_p1, %p44_p0  ;;  %s282_s21 = sshll.u32 %s1453_s20, 4  ;;  %s283_s21 = int_to_ptr.vmem [resolvable:$true] %s282_s21 }
   0xa   : > { %p1547_p5 = pnand %p1182_p2, %p270_p3  ;;  %s1454_s23 = smov [#allocation6]  }
   0xb   : > { %s2065_s18 = scalar_select %p1543_p4, 1, 0 }
   0xc   : > { %s2066_s19 = scalar_select %p1547_p5, 1, 0 }
   0xd   : > { %p1278_p6 = pneg %p1547_p5  ;;  %s304_s24 = sshll.u32 %s1454_s23, 4  ;;  %s305_s24 = int_to_ptr.vmem [resolvable:$true] %s304_s24 }
   0xe   : > { %s1344_s25 = scalar_lea.vmem %s283_s21, 1024  ;;  %p1352_p12 = scmp.lt.s32.totalorder %s283_s21, %s283_s21 }
   0xf   : > { %p1555_p7 = pnand %p1278_p6, %p2061_p1  ;;  %p1345_p9 = scmp.ne.s32.totalorder %s283_s21, %s1344_s25 }
  0x10   : > { %p1353_p13 = scmp.lt.s32.totalorder %s1344_s25, %s1344_s25 }
  0x11   : > { %p1335_p8 = pneg %p1555_p7 }
  0x12   : > { %p1354_p0 = por %p1353_p13, %p1352_p12 }
  0x13   : > { %p1347_p10 = pnand %p1345_p9, %p1335_p8 }
  0x15   : > { %p1348_p11 = pneg %p1347_p10 }
  0x17   : > { %p1355_p2 = pnand %p1354_p0, %p1348_p11 }
  0x19   : > { %1358 = shalt.err (!%p1355_p2)
}
  0x1a   : > { %s1455_s26 = smov 512   ;;  %s1456_s27 = smov 32  }
  0x1b   : > { %s2068_s1 = sld [smem:[#allocation9_spill]]  ;;  %s1370_s30 = scalar_lea.vmem %s305_s24, 8192 }
  0x1c   : > { %p1371_p3 = scmp.ne.s32.totalorder %s305_s24, %s1370_s30  ;;  %p1378_p10 = scmp.lt.s32.totalorder %s305_s24, %s305_s24 }
  0x1d   : > { %p1379_p1 = scmp.lt.s32.totalorder %s1370_s30, %s1370_s30 }
  0x1e   : > { %p1373_p6 = pnand %p1371_p3, %p1335_p8 }
  0x1f   : > { %p1380_p12 = por %p1379_p1, %p1378_p10 }
  0x20   : > { %p1374_p9 = pneg %p1373_p6 }
  0x21   : > { %1281 = dma.hbm_to_vmem [thread:$0]  (!%p1555_p7), %s2068_s1, 1024, %s283_s21, [#allocation5], %s1455_s26, %s1455_s26, %s1456_s27  }
  0x22   : > { %p1381_p11 = pnand %p1380_p12, %p1374_p9 }
  0x24   : > { %1384 = shalt.err (!%p1381_p11)
}
  0x25   : > { %s1457_s11 = smov 256   ;;  %s1458_s12 = smov 16  }
  0x26   : > { %1284 = dma.hbm_to_vmem [thread:$0]  (!%p1555_p7), %s2055_s5, 8192, %s305_s24, [#allocation5], %s1457_s11, %s1457_s11, %s1458_s12  }
  0x27   : > { %s1578_s21 = sadd.s32 1, %s1451_s16   ;;  %s31_s25 = sadd.s32 1, %s1447_s15 }
  0x28   : > { %s28_s23 = ssub.s32 %s1451_s16, %s1578_s21  ;;  %p38_p8 = scmp.ne.s32.totalorder %s1447_s15, %s1443_s14 }
  0x29   : > { %p29_p1 = scmp.eq.s32.totalorder %s28_s23, 0  ;;  %p39_p13 = scmp.eq.s32.totalorder %s1451_s16, 0 }
  0x2a   : > { %p1291_p2 = scmp.lt.s32.totalorder %s1451_s16, 2  ;;  %s330_s27 = sand.u32 1, %s1447_s15  }
  0x2b   : > { %s1587_s26 = scalar_select %p29_p1, %s1447_s15, %s31_s25  }
  0x2c   : > { %p40_p0 = por %p39_p13, %p38_p8  ;;  %s1187_s28 = sshll.u32 %s1451_s16, 7 }
  0x2d   : > { %s1186_s29 = sshll.u32 %s330_s27, 3  ;;  %s1595_s13 = scalar_lea.hbm %s2050_s0, %s1187_s28 }
  0x2e   : > { %s334_s24 = scalar_lea.vmem [#allocation2], %s1186_s29  ;;  %p1597_p7 = pnand %p1291_p2, %p40_p0 }
  0x2f   : > { %s341_s11 = sshll.u32 %s334_s24, 4  ;;  %s331_s20 = scalar_lea.sflag [#allocation3], %s330_s27  ;;  %s342_s11 = int_to_ptr.vmem [resolvable:$true] %s341_s11 }
  0x30   : > { %s1385_s23 = scalar_lea.hbm %s1595_s13, 128  ;;  %p1387_p6 = pneg %p1597_p7 }
  0x31   : > { %p1386_p3 = scmp.ne.s32.totalorder %s1595_s13, %s1385_s23  ;;  %s1390_s28 = scalar_lea.hbm %s2050_s0, 256 }
  0x32   : > { %p1391_p12 = scmp.lt.s32.totalorder %s1595_s13, %s2050_s0  ;;  %p1392_p11 = scmp.lt.s32.totalorder %s1390_s28, %s1385_s23 }
  0x33   : > { %p1388_p9 = pnand %p1387_p6, %p1386_p3 }
  0x34   : > { %p1393_p1 = por %p1392_p11, %p1391_p12 }
  0x35   : > { %p1389_p10 = pneg %p1388_p9 }
  0x37   : > { %p1394_p8 = pnand %p1393_p1, %p1389_p10 }
  0x39   : > { %1397 = shalt.err (!%p1394_p8)
}
  0x3a   : > { %s1398_s30 = scalar_lea.vmem %s342_s11, 128  ;;  %s1459_s27 = smov [#allocation2]  }
  0x3b   : > { %p1399_p13 = scmp.ne.s32.totalorder %s342_s11, %s1398_s30  ;;  %s1403_s24 = sshll.u32 %s1459_s27, 4  ;;  %s1404_s24 = int_to_ptr.vmem [resolvable:$false] %s1403_s24 }
  0x3c   : > { %s1405_s1 = scalar_lea.vmem %s1404_s24, 256  ;;  %p1406_p3 = scmp.lt.s32.totalorder %s342_s11, %s1404_s24 }
  0x3d   : > { %p1401_p0 = pnand %p1399_p13, %p1387_p6  ;;  %p1407_p9 = scmp.lt.s32.totalorder %s1405_s1, %s1398_s30 }
  0x3f   : > { %p1402_p2 = pneg %p1401_p0  ;;  %p1408_p4 = por %p1407_p9, %p1406_p3 }
  0x41   : > { %p1409_p5 = pnand %p1408_p4, %p1402_p2 }
  0x43   : > { %1412 = shalt.err (!%p1409_p5)
}
  0x44   : > { %1288 = dma.hbm_to_vmem [thread:$0]  (!%p1597_p7), %s1595_s13, 128, %s342_s11, %s331_s20  }
  0x45   : > { %p2070_p10 = scmp.ne.s32.totalorder %s2066_s19, 0 }
  0x46   : > { %s352_s23 = sand.u32 (!%p2070_p10), 1, %s1443_s14   ;;  %p2071_p6 = scmp.ne.s32.totalorder (!%p2070_p10), %s2065_s18, 0 }
  0x47   : > { %350 = sbr.rel (%p2070_p10) target bundleno = 688 (0x2b0), region = 60  ;;  %s1189_s16 = sshll.u32 (!%p2070_p10), %s352_s23, 3 }
  0x48   : > { %s353_s25 = scalar_lea.sflag (!%p2070_p10), [#allocation3], %s352_s23  ;;  %s356_s28 = scalar_lea.vmem (!%p2070_p10), [#allocation2], %s1189_s16 }
  0x4c   : > { %1430 = dma.done.wait (%p2071_p6), %s353_s25, 128  }
  0x4d   : > { %1432 = vsyncadd (%p2071_p6), %s353_s25, 4294967168  ;;  %p2072_p4 = scmp.eq.s32.totalorder %s1535_s17, 0 }
  0x4f   : > { %1434 = dma.done.wait (%p2072_p4), [#allocation5], 9216   ;;  %p2073_p5 = pmov %p2072_p4 }
  0x50   : > { %v1460_v0 = vmov 0.0   ;;  %v410_v1 = vld [vmem:[#allocation4 + $0x28] sm:$0xff]  ;;  %v412_v2 = vld [vmem:[#allocation4 + $0x38] sm:$0xff]  ;;  %v409_v3 = vld [vmem:[#allocation4 + $0x20] sm:$0xff]  ;;  %vm435_vm0 = vcmask 130048   ;;  %p400_p7 = scmp.lt.s32.totalorder %s1535_s17, 1 }
  0x51   : > { %1436 = vsyncadd (%p2073_p5), [#allocation5], 4294958080  ;;  %503 = vmatprep.mubr.f32.mxu0 %v1460_v0  ;;  %574 = vmatprep.mubr.f32.mxu1 %v1460_v0  ;;  %v411_v4 = vld [vmem:[#allocation4 + $0x30] sm:$0xff]  ;;  %v406_v5 = vld [vmem:[#allocation4 + $0x8] sm:$0xff]  ;;  %vm1095_vm1 = vcmask 15360  }
  0x52   : > { %467 = vmatprep.subr.mxu0 %v410_v1  ;;  %538 = vmatprep.subr.mxu1 %v412_v2  ;;  %v408_v6 = vld [vmem:[#allocation4 + $0x18] sm:$0xff]  ;;  %v405_v7 = vld [vmem:[#allocation4] sm:$0xff]  ;;  %v407_v8 = vld [vmem:[#allocation4 + $0x10] sm:$0xff]  ;;  %s2079_s17 = smov (!%p400_p7, %s1535_s17), 1 }
  0x53   : > { %468 = vmatpush1.msra.mxu0 %v409_v3  ;;  %539 = vmatpush1.msra.mxu1 %v411_v4  ;;  %v404_v9 = vld [vmem:[%s356_s28] sm:$0xff]  ;;  %v616_v10 = vld [vmem:[%s2053_s3 + $0xf8] sm:$0xff]  ;;  %v615_v12 = vld [vmem:[%s2053_s3 + $0xf0] sm:$0xff]  ;;  %s1192_s20 = sshll.u32 %s2079_s17, 3 }
  0x54   : > { %469 = vmatprep.subr.mxu0 %v406_v5  ;;  %540 = vmatprep.subr.mxu1 %v408_v6  ;;  %v765_v11 = vld [vmem:[#allocation6 + $0xf8] sm:$0xff]  ;;  %v764_v13 = vld [vmem:[#allocation6 + $0xf0] sm:$0xff]  ;;  %v763_v15 = vld [vmem:[#allocation6 + $0xe8] sm:$0xff]  ;;  %s403_s24 = scalar_lea.vmem %s2060_s10, %s1192_s20 }
  0x55   : > { %470 = vmatpush1.msra.mxu0 %v405_v7  ;;  %541 = vmatpush1.msra.mxu1 %v407_v8  ;;  %v614_v14 = vld [vmem:[%s2053_s3 + $0xe8] sm:$0xff]  ;;  %v613_v16 = vld [vmem:[%s2053_s3 + $0xe0] sm:$0xff]  ;;  %v762_v17 = vld [vmem:[#allocation6 + $0xe0] sm:$0xff] }
  0x56   : > { %1193 = vmatmul.mubr.msk.f32.vlgmr.msra.gmra.mxu0 %vm435_vm0, %v404_v9  ;;  %1194 = vmatmul.mubr.msk.f32.vlgmr.msra.gmra.mxu1 %vm435_vm0, %v404_v9  ;;  %v612_v18 = vld [vmem:[%s2053_s3 + $0xd8] sm:$0xff]  ;;  %v761_v19 = vld [vmem:[#allocation6 + $0xd8] sm:$0xff]  ;;  %v611_v20 = vld [vmem:[%s2053_s3 + $0xd0] sm:$0xff] }
  0x57   : > { %661 = vmatprep.subr.mxu0 %v616_v10  ;;  %810 = vmatprep.subr.mxu1 %v765_v11  ;;  %v760_v21 = vld [vmem:[#allocation6 + $0xd0] sm:$0xff]  ;;  %v610_v22 = vld [vmem:[%s2053_s3 + $0xc8] sm:$0xff]  ;;  %v759_v23 = vld [vmem:[#allocation6 + $0xc8] sm:$0xff] }
  0x58   : > { %662 = vmatpush1.msra.mxu0 %v615_v12  ;;  %811 = vmatpush1.msra.mxu1 %v764_v13  ;;  %v609_v24 = vld [vmem:[%s2053_s3 + $0xc0] sm:$0xff]  ;;  %v758_v25 = vld [vmem:[#allocation6 + $0xc0] sm:$0xff]  ;;  %v608_v26 = vld [vmem:[%s2053_s3 + $0xb8] sm:$0xff] }
  0x59   : > { %663 = vmatprep.subr.mxu0 %v614_v14  ;;  %812 = vmatprep.subr.mxu1 %v763_v15  ;;  %v757_v27 = vld [vmem:[#allocation6 + $0xb8] sm:$0xff]  ;;  %v607_v28 = vld [vmem:[%s2053_s3 + $0xb0] sm:$0xff]  ;;  %v756_v29 = vld [vmem:[#allocation6 + $0xb0] sm:$0xff] }
  0x5a   : > { %664 = vmatpush1.msra.mxu0 %v613_v16  ;;  %813 = vmatpush1.msra.mxu1 %v762_v17  ;;  %v606_v30 = vld [vmem:[%s2053_s3 + $0xa8] sm:$0xff]  ;;  %v755_v31 = vld [vmem:[#allocation6 + $0xa8] sm:$0xff]  ;;  %v605_v32 = vld [vmem:[%s2053_s3 + $0xa0] sm:$0xff] }
  0x5b   : > { %665 = vmatprep.subr.mxu0 %v612_v18  ;;  %814 = vmatprep.subr.mxu1 %v761_v19  ;;  %v754_v33 = vld [vmem:[#allocation6 + $0xa0] sm:$0xff]  ;;  %v604_v34 = vld [vmem:[%s2053_s3 + $0x98] sm:$0xff]  ;;  %v753_v35 = vld [vmem:[#allocation6 + $0x98] sm:$0xff] }
  0x5c   : > { %666 = vmatpush1.msra.mxu0 %v611_v20  ;;  %815 = vmatpush1.msra.mxu1 %v760_v21  ;;  %v603_v36 = vld [vmem:[%s2053_s3 + $0x90] sm:$0xff]  ;;  %v752_v37 = vld [vmem:[#allocation6 + $0x90] sm:$0xff]  ;;  %v602_v38 = vld [vmem:[%s2053_s3 + $0x88] sm:$0xff] }
  0x5d   : > { %667 = vmatprep.subr.mxu0 %v610_v22  ;;  %816 = vmatprep.subr.mxu1 %v759_v23  ;;  %v751_v39 = vld [vmem:[#allocation6 + $0x88] sm:$0xff]  ;;  %v601_v40 = vld [vmem:[%s2053_s3 + $0x80] sm:$0xff]  ;;  %v750_v41 = vld [vmem:[#allocation6 + $0x80] sm:$0xff] }
  0x5e   : > { %668 = vmatpush1.msra.mxu0 %v609_v24  ;;  %817 = vmatpush1.msra.mxu1 %v758_v25  ;;  %v600_v42 = vld [vmem:[%s2053_s3 + $0x78] sm:$0xff]  ;;  %v749_v43 = vld [vmem:[#allocation6 + $0x78] sm:$0xff]  ;;  %v599_v44 = vld [vmem:[%s2053_s3 + $0x70] sm:$0xff] }
  0x5f   : > { %669 = vmatprep.subr.mxu0 %v608_v26  ;;  %818 = vmatprep.subr.mxu1 %v757_v27  ;;  %v748_v45 = vld [vmem:[#allocation6 + $0x70] sm:$0xff]  ;;  %v598_v46 = vld [vmem:[%s2053_s3 + $0x68] sm:$0xff]  ;;  %v747_v47 = vld [vmem:[#allocation6 + $0x68] sm:$0xff] }
  0x60   : > { %670 = vmatpush1.msra.mxu0 %v607_v28  ;;  %819 = vmatpush1.msra.mxu1 %v756_v29  ;;  %v597_v48 = vld [vmem:[%s2053_s3 + $0x60] sm:$0xff]  ;;  %v746_v49 = vld [vmem:[#allocation6 + $0x60] sm:$0xff]  ;;  %v596_v50 = vld [vmem:[%s2053_s3 + $0x58] sm:$0xff] }
  0x61   : > { %671 = vmatprep.subr.mxu0 %v606_v30  ;;  %820 = vmatprep.subr.mxu1 %v755_v31  ;;  %v745_v51 = vld [vmem:[#allocation6 + $0x58] sm:$0xff]  ;;  %v595_v52 = vld [vmem:[%s2053_s3 + $0x50] sm:$0xff]  ;;  %v744_v53 = vld [vmem:[#allocation6 + $0x50] sm:$0xff] }
  0x62   : > { %672 = vmatpush1.msra.mxu0 %v605_v32  ;;  %821 = vmatpush1.msra.mxu1 %v754_v33  ;;  %v594_v54 = vld [vmem:[%s2053_s3 + $0x48] sm:$0xff]  ;;  %v743_v55 = vld [vmem:[#allocation6 + $0x48] sm:$0xff]  ;;  %v593_v56 = vld [vmem:[%s2053_s3 + $0x40] sm:$0xff] }
  0x63   : > { %673 = vmatprep.subr.mxu0 %v604_v34  ;;  %822 = vmatprep.subr.mxu1 %v753_v35  ;;  %v742_v57 = vld [vmem:[#allocation6 + $0x40] sm:$0xff]  ;;  %v592_v58 = vld [vmem:[%s2053_s3 + $0x38] sm:$0xff]  ;;  %v741_v59 = vld [vmem:[#allocation6 + $0x38] sm:$0xff] }
  0x64   : > { %674 = vmatpush1.msra.mxu0 %v603_v36  ;;  %823 = vmatpush1.msra.mxu1 %v752_v37  ;;  %v591_v60 = vld [vmem:[%s2053_s3 + $0x30] sm:$0xff]  ;;  %v740_v61 = vld [vmem:[#allocation6 + $0x30] sm:$0xff]  ;;  %v590_v62 = vld [vmem:[%s2053_s3 + $0x28] sm:$0xff] }
  0x65   : > { %675 = vmatprep.subr.mxu0 %v602_v38  ;;  %824 = vmatprep.subr.mxu1 %v751_v39  ;;  %v739_v63 = vld [vmem:[#allocation6 + $0x28] sm:$0xff]  ;;  %v589_v0 = vld [vmem:[%s2053_s3 + $0x20] sm:$0xff]  ;;  %v738_v1 = vld [vmem:[#allocation6 + $0x20] sm:$0xff] }
  0x66   : > { %676 = vmatpush1.msra.mxu0 %v601_v40  ;;  %825 = vmatpush1.msra.mxu1 %v750_v41  ;;  %v588_v2 = vld [vmem:[%s2053_s3 + $0x18] sm:$0xff]  ;;  %v737_v3 = vld [vmem:[#allocation6 + $0x18] sm:$0xff]  ;;  %v587_v4 = vld [vmem:[%s2053_s3 + $0x10] sm:$0xff] }
  0x67   : > { %677 = vmatprep.subr.mxu0 %v600_v42  ;;  %826 = vmatprep.subr.mxu1 %v749_v43  ;;  %v736_v5 = vld [vmem:[#allocation6 + $0x10] sm:$0xff]  ;;  %v586_v6 = vld [vmem:[%s2053_s3 + $0x8] sm:$0xff]  ;;  %v735_v7 = vld [vmem:[#allocation6 + $0x8] sm:$0xff] }
  0x68   : > { %678 = vmatpush1.msra.mxu0 %v599_v44  ;;  %827 = vmatpush1.msra.mxu1 %v748_v45  ;;  %v585_v8 = vld [vmem:[%s2053_s3] sm:$0xff]  ;;  %v734_v9 = vld [vmem:[#allocation6] sm:$0xff]  ;;  %v648_v10 = vld [vmem:[%s2053_s3 + $0x1f8] sm:$0xff] }
  0x69   : > { %679 = vmatprep.subr.mxu0 %v598_v46  ;;  %828 = vmatprep.subr.mxu1 %v747_v47  ;;  %v797_v11 = vld [vmem:[#allocation6 + $0x1f8] sm:$0xff]  ;;  %v647_v12 = vld [vmem:[%s2053_s3 + $0x1f0] sm:$0xff]  ;;  %v796_v13 = vld [vmem:[#allocation6 + $0x1f0] sm:$0xff] }
  0x6a   : > { %680 = vmatpush1.msra.mxu0 %v597_v48  ;;  %829 = vmatpush1.msra.mxu1 %v746_v49  ;;  %v646_v14 = vld [vmem:[%s2053_s3 + $0x1e8] sm:$0xff]  ;;  %v795_v15 = vld [vmem:[#allocation6 + $0x1e8] sm:$0xff]  ;;  %v645_v16 = vld [vmem:[%s2053_s3 + $0x1e0] sm:$0xff] }
  0x6b   : > { %681 = vmatprep.subr.mxu0 %v596_v50  ;;  %830 = vmatprep.subr.mxu1 %v745_v51  ;;  %v794_v17 = vld [vmem:[#allocation6 + $0x1e0] sm:$0xff]  ;;  %v644_v18 = vld [vmem:[%s2053_s3 + $0x1d8] sm:$0xff]  ;;  %v793_v19 = vld [vmem:[#allocation6 + $0x1d8] sm:$0xff] }
  0x6c   : > { %682 = vmatpush1.msra.mxu0 %v595_v52  ;;  %831 = vmatpush1.msra.mxu1 %v744_v53  ;;  %v643_v20 = vld [vmem:[%s2053_s3 + $0x1d0] sm:$0xff]  ;;  %v792_v21 = vld [vmem:[#allocation6 + $0x1d0] sm:$0xff]  ;;  %v642_v22 = vld [vmem:[%s2053_s3 + $0x1c8] sm:$0xff] }
  0x6d   : > { %683 = vmatprep.subr.mxu0 %v594_v54  ;;  %832 = vmatprep.subr.mxu1 %v743_v55  ;;  %v791_v23 = vld [vmem:[#allocation6 + $0x1c8] sm:$0xff]  ;;  %v641_v24 = vld [vmem:[%s2053_s3 + $0x1c0] sm:$0xff]  ;;  %v790_v25 = vld [vmem:[#allocation6 + $0x1c0] sm:$0xff] }
  0x6e   : > { %684 = vmatpush1.msra.mxu0 %v593_v56  ;;  %833 = vmatpush1.msra.mxu1 %v742_v57  ;;  %v640_v26 = vld [vmem:[%s2053_s3 + $0x1b8] sm:$0xff]  ;;  %v789_v27 = vld [vmem:[#allocation6 + $0x1b8] sm:$0xff]  ;;  %v639_v28 = vld [vmem:[%s2053_s3 + $0x1b0] sm:$0xff] }
  0x6f   : > { %685 = vmatprep.subr.mxu0 %v592_v58  ;;  %834 = vmatprep.subr.mxu1 %v741_v59  ;;  %v788_v29 = vld [vmem:[#allocation6 + $0x1b0] sm:$0xff]  ;;  %v638_v30 = vld [vmem:[%s2053_s3 + $0x1a8] sm:$0xff]  ;;  %v787_v31 = vld [vmem:[#allocation6 + $0x1a8] sm:$0xff] }
  0x70   : > { %686 = vmatpush1.msra.mxu0 %v591_v60  ;;  %835 = vmatpush1.msra.mxu1 %v740_v61  ;;  %v637_v32 = vld [vmem:[%s2053_s3 + $0x1a0] sm:$0xff]  ;;  %v786_v33 = vld [vmem:[#allocation6 + $0x1a0] sm:$0xff]  ;;  %v636_v34 = vld [vmem:[%s2053_s3 + $0x198] sm:$0xff] }
  0x71   : > { %687 = vmatprep.subr.mxu0 %v590_v62  ;;  %836 = vmatprep.subr.mxu1 %v739_v63  ;;  %v785_v35 = vld [vmem:[#allocation6 + $0x198] sm:$0xff]  ;;  %v635_v36 = vld [vmem:[%s2053_s3 + $0x190] sm:$0xff]  ;;  %v784_v37 = vld [vmem:[#allocation6 + $0x190] sm:$0xff] }
  0x72   : > { %688 = vmatpush1.msra.mxu0 %v589_v0  ;;  %837 = vmatpush1.msra.mxu1 %v738_v1  ;;  %v634_v38 = vld [vmem:[%s2053_s3 + $0x188] sm:$0xff]  ;;  %v783_v39 = vld [vmem:[#allocation6 + $0x188] sm:$0xff]  ;;  %v633_v40 = vld [vmem:[%s2053_s3 + $0x180] sm:$0xff] }
  0x73   : > { %689 = vmatprep.subr.mxu0 %v588_v2  ;;  %838 = vmatprep.subr.mxu1 %v737_v3  ;;  %v782_v41 = vld [vmem:[#allocation6 + $0x180] sm:$0xff]  ;;  %v632_v42 = vld [vmem:[%s2053_s3 + $0x178] sm:$0xff]  ;;  %v781_v43 = vld [vmem:[#allocation6 + $0x178] sm:$0xff] }
  0x74   : > { %690 = vmatpush1.msra.mxu0 %v587_v4  ;;  %839 = vmatpush1.msra.mxu1 %v736_v5  ;;  %v631_v44 = vld [vmem:[%s2053_s3 + $0x170] sm:$0xff]  ;;  %v780_v45 = vld [vmem:[#allocation6 + $0x170] sm:$0xff]  ;;  %v630_v46 = vld [vmem:[%s2053_s3 + $0x168] sm:$0xff] }
  0x75   : > { %691 = vmatprep.subr.mxu0 %v586_v6  ;;  %840 = vmatprep.subr.mxu1 %v735_v7  ;;  %v779_v47 = vld [vmem:[#allocation6 + $0x168] sm:$0xff]  ;;  %v629_v48 = vld [vmem:[%s2053_s3 + $0x160] sm:$0xff]  ;;  %v778_v49 = vld [vmem:[#allocation6 + $0x160] sm:$0xff] }
  0x76   : > { %692 = vmatpush1.msra.mxu0 %v585_v8  ;;  %841 = vmatpush1.msra.mxu1 %v734_v9  ;;  %v628_v50 = vld [vmem:[%s2053_s3 + $0x158] sm:$0xff]  ;;  %v777_v51 = vld [vmem:[#allocation6 + $0x158] sm:$0xff]  ;;  %v627_v52 = vld [vmem:[%s2053_s3 + $0x150] sm:$0xff] }
  0x77   : > { %693 = vmatprep.subr.mxu0 %v648_v10  ;;  %842 = vmatprep.subr.mxu1 %v797_v11  ;;  %v776_v53 = vld [vmem:[#allocation6 + $0x150] sm:$0xff]  ;;  %v626_v54 = vld [vmem:[%s2053_s3 + $0x148] sm:$0xff]  ;;  %v775_v55 = vld [vmem:[#allocation6 + $0x148] sm:$0xff] }
  0x78   : > { %694 = vmatpush2.msra.mxu0 %v647_v12  ;;  %843 = vmatpush2.msra.mxu1 %v796_v13  ;;  %v625_v56 = vld [vmem:[%s2053_s3 + $0x140] sm:$0xff]  ;;  %v774_v57 = vld [vmem:[#allocation6 + $0x140] sm:$0xff]  ;;  %v624_v58 = vld [vmem:[%s2053_s3 + $0x138] sm:$0xff]  ;;  %v415_v12 = vlaneseq }
  0x79   : > { %695 = vmatprep.subr.mxu0 %v646_v14  ;;  %844 = vmatprep.subr.mxu1 %v795_v15  ;;  %v773_v59 = vld [vmem:[#allocation6 + $0x138] sm:$0xff]  ;;  %v623_v60 = vld [vmem:[%s2053_s3 + $0x130] sm:$0xff]  ;;  %v772_v61 = vld [vmem:[#allocation6 + $0x130] sm:$0xff] }
  0x7a   : > { %696 = vmatpush2.msra.mxu0 %v645_v16  ;;  %845 = vmatpush2.msra.mxu1 %v794_v17  ;;  %v622_v62 = vld [vmem:[%s2053_s3 + $0x128] sm:$0xff]  ;;  %v771_v63 = vld [vmem:[#allocation6 + $0x128] sm:$0xff]  ;;  %v621_v0 = vld [vmem:[%s2053_s3 + $0x120] sm:$0xff]  ;;  %v416_v13 = vshrl.u32 %v415_v12, 7 }
  0x7b   : > { %697 = vmatprep.subr.mxu0 %v644_v18  ;;  %846 = vmatprep.subr.mxu1 %v793_v19  ;;  %v770_v1 = vld [vmem:[#allocation6 + $0x120] sm:$0xff]  ;;  %v620_v2 = vld [vmem:[%s2053_s3 + $0x118] sm:$0xff]  ;;  %v769_v3 = vld [vmem:[#allocation6 + $0x118] sm:$0xff] }
  0x7c   : > { %698 = vmatpush2.msra.mxu0 %v643_v20  ;;  %847 = vmatpush2.msra.mxu1 %v792_v21  ;;  %v619_v4 = vld [vmem:[%s2053_s3 + $0x110] sm:$0xff]  ;;  %v768_v5 = vld [vmem:[#allocation6 + $0x110] sm:$0xff]  ;;  %v618_v6 = vld [vmem:[%s2053_s3 + $0x108] sm:$0xff]  ;;  %v1824_v14 = vsub.s32 0, %v416_v13  ;;  %v425_v15 = vsub.s32 2, %v416_v13  ;;  %v1829_v17 = vsub.s32 1, %v416_v13 }
  0x7d   : > { %699 = vmatprep.subr.mxu0 %v642_v22  ;;  %848 = vmatprep.subr.mxu1 %v791_v23  ;;  %v767_v7 = vld [vmem:[#allocation6 + $0x108] sm:$0xff]  ;;  %v617_v8 = vld [vmem:[%s2053_s3 + $0x100] sm:$0xff]  ;;  %v766_v9 = vld [vmem:[#allocation6 + $0x100] sm:$0xff]  ;;  %v429_v18 = vsub.s32 3, %v416_v13 }
  0x7e   : > { %700 = vmatpush2.msra.mxu0 %v641_v24  ;;  %849 = vmatpush2.msra.mxu1 %v790_v25  ;;  %v946_v10 = vld [vmem:[%s2058_s8 + $0xf8] sm:$0xff]  ;;  %v413_v16 = vld [vmem:[%s2052_s2] sm:$0xf]  ;;  %v888_v12 = vld [vmem:[%s2057_s7 + $0x28] sm:$0xff] }
  0x7f   : > { %701 = vmatprep.subr.mxu0 %v640_v26  ;;  %850 = vmatprep.subr.mxu1 %v789_v27  ;;  %v914_v11 = vld [vmem:[%s2057_s7 + $0xf8] sm:$0xff]  ;;  %v418_v19 = vrot.slane %v413_v16, %v1824_v14  ;;  %v426_v20 = vrot.slane %v413_v16, %v425_v15  ;;  %v422_v21 = vrot.slane %v413_v16, %v1829_v17  ;;  %v935_v13 = vld [vmem:[%s2058_s8 + $0xa0] sm:$0xff] }
  0x80   : > { %702 = vmatpush2.msra.mxu0 %v639_v28  ;;  %851 = vmatpush2.msra.mxu1 %v788_v29  ;;  %v430_v22 = vrot.slane %v413_v16, %v429_v18  ;;  %v903_v15 = vld [vmem:[%s2057_s7 + $0xa0] sm:$0xff] }
  0x81   : > { %703 = vmatprep.subr.mxu0 %v638_v30  ;;  %852 = vmatprep.subr.mxu1 %v787_v31  ;;  %v919_v16 = vld [vmem:[%s2058_s8 + $0x20] sm:$0xff] }
  0x82   : > { %704 = vmatpush2.msra.mxu0 %v637_v32  ;;  %853 = vmatpush2.msra.mxu1 %v786_v33  ;;  %v887_v18 = vld [vmem:[%s2057_s7 + $0x20] sm:$0xff] }
  0x83   : > { %705 = vmatprep.subr.mxu0 %v636_v34  ;;  %854 = vmatprep.subr.mxu1 %v785_v35  ;;  %v930_v35 = vld [vmem:[%s2058_s8 + $0x78] sm:$0xff] }
  0x84   : > { %706 = vmatpush2.msra.mxu0 %v635_v36  ;;  %855 = vmatpush2.msra.mxu1 %v784_v37  ;;  %v898_v36 = vld [vmem:[%s2057_s7 + $0x78] sm:$0xff]  ;;  %v945_v37 = vld [vmem:[%s2058_s8 + $0xf0] sm:$0xff] }
  0x85   : > { %707 = vmatprep.subr.mxu0 %v634_v38  ;;  %856 = vmatprep.subr.mxu1 %v783_v39  ;;  %v913_v38 = vld [vmem:[%s2057_s7 + $0xf0] sm:$0xff] }
  0x86   : > { %708 = vmatpush2.msra.mxu0 %v633_v40  ;;  %857 = vmatpush2.msra.mxu1 %v782_v41  ;;  %v929_v39 = vld [vmem:[%s2058_s8 + $0x70] sm:$0xff]  ;;  %v944_v41 = vld [vmem:[%s2058_s8 + $0xe8] sm:$0xff] }
  0x87   : > { %709 = vmatprep.subr.mxu0 %v632_v42  ;;  %858 = vmatprep.subr.mxu1 %v781_v43  ;;  %v897_v40 = vld [vmem:[%s2057_s7 + $0x70] sm:$0xff]  ;;  %v912_v42 = vld [vmem:[%s2057_s7 + $0xe8] sm:$0xff] }
  0x88   : > { %710 = vmatpush2.msra.mxu0 %v631_v44  ;;  %859 = vmatpush2.msra.mxu1 %v780_v45  ;;  %v928_v43 = vld [vmem:[%s2058_s8 + $0x68] sm:$0xff]  ;;  %v943_v45 = vld [vmem:[%s2058_s8 + $0xe0] sm:$0xff] }
  0x89   : > { %711 = vmatprep.subr.mxu0 %v630_v46  ;;  %860 = vmatprep.subr.mxu1 %v779_v47  ;;  %v896_v44 = vld [vmem:[%s2057_s7 + $0x68] sm:$0xff]  ;;  %v911_v46 = vld [vmem:[%s2057_s7 + $0xe0] sm:$0xff] }
  0x8a   : > { %712 = vmatpush2.msra.mxu0 %v629_v48  ;;  %861 = vmatpush2.msra.mxu1 %v778_v49  ;;  %v927_v47 = vld [vmem:[%s2058_s8 + $0x60] sm:$0xff]  ;;  %v942_v49 = vld [vmem:[%s2058_s8 + $0xd8] sm:$0xff] }
  0x8b   : > { %713 = vmatprep.subr.mxu0 %v628_v50  ;;  %862 = vmatprep.subr.mxu1 %v777_v51  ;;  %v895_v48 = vld [vmem:[%s2057_s7 + $0x60] sm:$0xff]  ;;  %v910_v50 = vld [vmem:[%s2057_s7 + $0xd8] sm:$0xff] }
  0x8c   : > { %714 = vmatpush2.msra.mxu0 %v627_v52  ;;  %863 = vmatpush2.msra.mxu1 %v776_v53  ;;  %v926_v51 = vld [vmem:[%s2058_s8 + $0x58] sm:$0xff]  ;;  %v941_v53 = vld [vmem:[%s2058_s8 + $0xd0] sm:$0xff] }
  0x8d   : > { %715 = vmatprep.subr.mxu0 %v626_v54  ;;  %864 = vmatprep.subr.mxu1 %v775_v55  ;;  %v894_v52 = vld [vmem:[%s2057_s7 + $0x58] sm:$0xff]  ;;  %v909_v54 = vld [vmem:[%s2057_s7 + $0xd0] sm:$0xff] }
  0x8e   : > { %716 = vmatpush2.msra.mxu0 %v625_v56  ;;  %865 = vmatpush2.msra.mxu1 %v774_v57  ;;  %v925_v55 = vld [vmem:[%s2058_s8 + $0x50] sm:$0xff]  ;;  %v940_v57 = vld [vmem:[%s2058_s8 + $0xc8] sm:$0xff] }
  0x8f   : > { %717 = vmatprep.subr.mxu0 %v624_v58  ;;  %866 = vmatprep.subr.mxu1 %v773_v59  ;;  %v893_v56 = vld [vmem:[%s2057_s7 + $0x50] sm:$0xff]  ;;  %v908_v58 = vld [vmem:[%s2057_s7 + $0xc8] sm:$0xff] }
  0x90   : > { %718 = vmatpush2.msra.mxu0 %v623_v60  ;;  %867 = vmatpush2.msra.mxu1 %v772_v61  ;;  %v924_v59 = vld [vmem:[%s2058_s8 + $0x48] sm:$0xff]  ;;  %v939_v61 = vld [vmem:[%s2058_s8 + $0xc0] sm:$0xff] }
  0x91   : > { %719 = vmatprep.subr.mxu0 %v622_v62  ;;  %868 = vmatprep.subr.mxu1 %v771_v63  ;;  %v892_v60 = vld [vmem:[%s2057_s7 + $0x48] sm:$0xff]  ;;  %v907_v62 = vld [vmem:[%s2057_s7 + $0xc0] sm:$0xff] }
  0x92   : > { %720 = vmatpush2.msra.mxu0 %v621_v0  ;;  %869 = vmatpush2.msra.mxu1 %v770_v1  ;;  %v923_v63 = vld [vmem:[%s2058_s8 + $0x40] sm:$0xff]  ;;  %v938_v1 = vld [vmem:[%s2058_s8 + $0xb8] sm:$0xff] }
  0x93   : > { %721 = vmatprep.subr.mxu0 %v620_v2  ;;  %870 = vmatprep.subr.mxu1 %v769_v3  ;;  %v891_v0 = vld [vmem:[%s2057_s7 + $0x40] sm:$0xff]  ;;  %v906_v2 = vld [vmem:[%s2057_s7 + $0xb8] sm:$0xff] }
  0x94   : > { %722 = vmatpush2.msra.mxu0 %v619_v4  ;;  %871 = vmatpush2.msra.mxu1 %v768_v5  ;;  %v922_v3 = vld [vmem:[%s2058_s8 + $0x38] sm:$0xff]  ;;  %v937_v5 = vld [vmem:[%s2058_s8 + $0xb0] sm:$0xff] }
  0x95   : > { %723 = vmatprep.subr.mxu0 %v618_v6  ;;  %872 = vmatprep.subr.mxu1 %v767_v7  ;;  %v890_v4 = vld [vmem:[%s2057_s7 + $0x38] sm:$0xff]  ;;  %v905_v6 = vld [vmem:[%s2057_s7 + $0xb0] sm:$0xff] }
  0x96   : > { %724 = vmatpush2.msra.mxu0 %v617_v8  ;;  %873 = vmatpush2.msra.mxu1 %v766_v9  ;;  %v921_v7 = vld [vmem:[%s2058_s8 + $0x30] sm:$0xff]  ;;  %v936_v9 = vld [vmem:[%s2058_s8 + $0xa8] sm:$0xff] }
  0x97   : > { %1198 = vmatprep.subr.mxu0 %v946_v10  ;;  %1233 = vmatprep.subr.mxu1 %v914_v11  ;;  %v889_v8 = vld [vmem:[%s2057_s7 + $0x30] sm:$0xff]  ;;  %v904_v10 = vld [vmem:[%s2057_s7 + $0xa8] sm:$0xff] }
  0x98   : > { %v920_v11 = vld [vmem:[%s2058_s8 + $0x28] sm:$0xff] }
 0x116   : > { %v505_v23 = vpop.f32.mrf.mxu0  ;;  %v576_v24 = vpop.f32.mrf.mxu1 }
 0x117   : > { %v506_v25 = vadd.f32 %v505_v23, %v418_v19  ;;  %v577_v26 = vadd.f32 %v576_v24, %v426_v20  ;;  %v934_v19 = vld [vmem:[%s2058_s8 + $0x98] sm:$0xff]  ;;  %v933_v23 = vld [vmem:[%s2058_s8 + $0x90] sm:$0xff] }
 0x118   : > { %v507_v27 = vpop.f32.mrf.mxu0  ;;  %v578_v28 = vpop.f32.mrf.mxu1  ;;  %v902_v20 = vld [vmem:[%s2057_s7 + $0x98] sm:$0xff]  ;;  %v901_v24 = vld [vmem:[%s2057_s7 + $0x90] sm:$0xff] }
 0x119   : > { %v508_v29 = vadd.f32 %v507_v27, %v422_v21  ;;  %v579_v30 = vadd.f32 %v578_v28, %v430_v22  ;;  %v581_v33 = vmax.f32 %v506_v25, 0.0  ;;  %v583_v34 = vmax.f32 %v577_v26, 0.0  ;;  %v918_v21 = vld [vmem:[%s2058_s8 + $0x18] sm:$0xff]  ;;  %v917_v25 = vld [vmem:[%s2058_s8 + $0x10] sm:$0xff]  ;;  %v932_v27 = vld [vmem:[%s2058_s8 + $0x88] sm:$0xff] }
 0x11a   : > { %v886_v22 = vld [vmem:[%s2057_s7 + $0x18] sm:$0xff]  ;;  %v885_v26 = vld [vmem:[%s2057_s7 + $0x10] sm:$0xff]  ;;  %v900_v28 = vld [vmem:[%s2057_s7 + $0x88] sm:$0xff] }
 0x11b   : > { %v582_v31 = vmax.f32 %v508_v29, 0.0  ;;  %v584_v32 = vmax.f32 %v579_v30, 0.0  ;;  %v916_v29 = vld [vmem:[%s2058_s8 + $0x8] sm:$0xff] }
 0x11c   : > { %v884_v30 = vld [vmem:[%s2057_s7 + $0x8] sm:$0xff] }
 0x11d   : > { %725 = vmatprep.mubr.f32.mxu0 %v582_v31  ;;  %874 = vmatprep.mubr.f32.mxu1 %v584_v32  ;;  %v931_v31 = vld [vmem:[%s2058_s8 + $0x80] sm:$0xff] }
 0x11e   : > { %726 = vmatmul.mubr.f32.vlgmr.msra.gmra.mxu0 %v581_v33  ;;  %875 = vmatmul.mubr.f32.vlgmr.msra.gmra.mxu1 %v583_v34  ;;  %v899_v32 = vld [vmem:[%s2057_s7 + $0x80] sm:$0xff] }
 0x11f   : > { %1199 = vmatpush3.msra.mxu0 %v930_v35  ;;  %1234 = vmatpush3.msra.mxu1 %v898_v36  ;;  %v915_v33 = vld [vmem:[%s2058_s8] sm:$0xff] }
 0x120   : > { %1200 = vmatprep.subr.mxu0 %v945_v37  ;;  %1235 = vmatprep.subr.mxu1 %v913_v38  ;;  %v883_v34 = vld [vmem:[%s2057_s7] sm:$0xff] }
 0x121   : > { %1201 = vmatpush3.msra.mxu0 %v929_v39  ;;  %1236 = vmatpush3.msra.mxu1 %v897_v40  ;;  %v649_v35 = vld [vmem:[%s2054_s4] sm:$0x3] }
 0x122   : > { %1202 = vmatprep.subr.mxu0 %v944_v41  ;;  %1237 = vmatprep.subr.mxu1 %v912_v42  ;;  %v798_v36 = vld [vmem:[%s2056_s6] sm:$0x3]  ;;  %v654_v37 = vrot.slane %v649_v35, %v1824_v14  ;;  %v658_v39 = vrot.slane %v649_v35, %v1829_v17 }
 0x123   : > { %1203 = vmatpush3.msra.mxu0 %v928_v43  ;;  %1238 = vmatpush3.msra.mxu1 %v896_v44  ;;  %v803_v38 = vrot.slane %v798_v36, %v1824_v14  ;;  %v807_v40 = vrot.slane %v798_v36, %v1829_v17 }
 0x124   : > { %1204 = vmatprep.subr.mxu0 %v943_v45  ;;  %1239 = vmatprep.subr.mxu1 %v911_v46 }
 0x125   : > { %1205 = vmatpush3.msra.mxu0 %v927_v47  ;;  %1240 = vmatpush3.msra.mxu1 %v895_v48 }
 0x126   : > { %1206 = vmatprep.subr.mxu0 %v942_v49  ;;  %1241 = vmatprep.subr.mxu1 %v910_v50 }
 0x127   : > { %1207 = vmatpush3.msra.mxu0 %v926_v51  ;;  %1242 = vmatpush3.msra.mxu1 %v894_v52 }
 0x128   : > { %1208 = vmatprep.subr.mxu0 %v941_v53  ;;  %1243 = vmatprep.subr.mxu1 %v909_v54 }
 0x129   : > { %1209 = vmatpush3.msra.mxu0 %v925_v55  ;;  %1244 = vmatpush3.msra.mxu1 %v893_v56 }
 0x12a   : > { %1210 = vmatprep.subr.mxu0 %v940_v57  ;;  %1245 = vmatprep.subr.mxu1 %v908_v58  ;;  %v1195_v57 = vld [vmem:[%s2059_s9] ss:$0 sm:$0xff] }
 0x12b   : > { %1211 = vmatpush3.msra.mxu0 %v924_v59  ;;  %1246 = vmatpush3.msra.mxu1 %v892_v60 }
 0x12c   : > { %1212 = vmatprep.subr.mxu0 %v939_v61  ;;  %1247 = vmatprep.subr.mxu1 %v907_v62 }
 0x12d   : > { %1213 = vmatpush3.msra.mxu0 %v923_v63  ;;  %1248 = vmatpush3.msra.mxu1 %v891_v0 }
 0x12e   : > { %1214 = vmatprep.subr.mxu0 %v938_v1  ;;  %1249 = vmatprep.subr.mxu1 %v906_v2 }
 0x12f   : > { %1215 = vmatpush3.msra.mxu0 %v922_v3  ;;  %1250 = vmatpush3.msra.mxu1 %v890_v4 }
 0x130   : > { %1216 = vmatprep.subr.mxu0 %v937_v5  ;;  %1251 = vmatprep.subr.mxu1 %v905_v6 }
 0x131   : > { %1217 = vmatpush3.msra.mxu0 %v921_v7  ;;  %1252 = vmatpush3.msra.mxu1 %v889_v8 }
 0x132   : > { %1218 = vmatprep.subr.mxu0 %v936_v9  ;;  %1253 = vmatprep.subr.mxu1 %v904_v10 }
 0x133   : > { %1219 = vmatpush3.msra.mxu0 %v920_v11  ;;  %1254 = vmatpush3.msra.mxu1 %v888_v12 }
 0x134   : > { %1220 = vmatprep.subr.mxu0 %v935_v13  ;;  %1255 = vmatprep.subr.mxu1 %v903_v15 }
 0x135   : > { %1221 = vmatpush3.msra.mxu0 %v919_v16  ;;  %1256 = vmatpush3.msra.mxu1 %v887_v18 }
 0x136   : > { %1222 = vmatprep.subr.mxu0 %v934_v19  ;;  %1257 = vmatprep.subr.mxu1 %v902_v20 }
 0x137   : > { %1223 = vmatpush3.msra.mxu0 %v918_v21  ;;  %1258 = vmatpush3.msra.mxu1 %v886_v22 }
 0x138   : > { %1224 = vmatprep.subr.mxu0 %v933_v23  ;;  %1259 = vmatprep.subr.mxu1 %v901_v24 }
 0x139   : > { %1225 = vmatpush3.msra.mxu0 %v917_v25  ;;  %1260 = vmatpush3.msra.mxu1 %v885_v26 }
 0x13a   : > { %1226 = vmatprep.subr.mxu0 %v932_v27  ;;  %1261 = vmatprep.subr.mxu1 %v900_v28 }
 0x13b   : > { %1227 = vmatpush3.msra.mxu0 %v916_v29  ;;  %1262 = vmatpush3.msra.mxu1 %v884_v30 }
 0x13c   : > { %1228 = vmatprep.subr.mxu0 %v931_v31  ;;  %1263 = vmatprep.subr.mxu1 %v899_v32 }
 0x13d   : > { %1229 = vmatpush3.msra.mxu0 %v915_v33  ;;  %1264 = vmatpush3.msra.mxu1 %v883_v34 }
 0x1de   : > { %v727_v41 = vpop.f32.mrf.mxu0  ;;  %v876_v42 = vpop.f32.mrf.mxu1 }
 0x1df   : > { %v728_v43 = vadd.f32 %v727_v41, %v654_v37  ;;  %v877_v44 = vadd.f32 %v876_v42, %v803_v38 }
 0x1e0   : > { %v729_v45 = vpop.f32.mrf.mxu0  ;;  %v878_v46 = vpop.f32.mrf.mxu1 }
 0x1e1   : > { %v730_v47 = vadd.f32 %v729_v45, %v658_v39  ;;  %v879_v48 = vadd.f32 %v878_v46, %v807_v40  ;;  %v732_v51 = vmax.f32 %v728_v43, 0.0  ;;  %v881_v52 = vmax.f32 %v877_v44, 0.0 }
 0x1e3   : > { %v733_v49 = vmax.f32 %v730_v47, 0.0  ;;  %v882_v50 = vmax.f32 %v879_v48, 0.0 }
 0x1e5   : > { %1011 = vmatprep.mubr.f32.mxu0 %v882_v50  ;;  %1081 = vmatprep.mubr.f32.mxu1 %v733_v49 }
 0x1e6   : > { %1012 = vmatmul.mubr.f32.vlgmr.msra.gmra.mxu0 %v881_v52  ;;  %1082 = vmatmul.mubr.f32.vlgmr.msra.gmra.mxu1 %v732_v51 }
 0x2a6   : > { %v1230_v14 = vpop.f32.mrf.mxu0  ;;  %v1265_v17 = vpop.f32.mrf.mxu1 }
 0x2a8   : > { %v1231_v53 = vpop.f32.mrf.mxu0  ;;  %v1266_v54 = vpop.f32.mrf.mxu1 }
 0x2a9   : > { %v1232_v55 = vadd.f32 %v1231_v53, %v1230_v14  ;;  %v1267_v56 = vadd.f32 %v1266_v54, %v1265_v17 }
 0x2ab   : > { %v1084_v58 = vadd.f32 %v1267_v56, %v1232_v55 }
 0x2ad   : > { %v1094_v59 = vadd.f32 %v1195_v57, %v1084_v58 }
 0x2af   : > { %1096 = vst.msk [vmem:[%s403_s24] sm:$0xff] %vm1095_vm1, %v1094_v59 }
 0x2b0 PF: > { %p21_p12 = scmp.ge.s32.totalorder %s1578_s21, 4   ;;  %s2074_s13 = smov %s1443_s14 }
 0x2b1   : > { %s2075_s14 = smov %s1447_s15  ;;  %s2076_s15 = smov %s1587_s26 }
 0x2b2   : > { %s2077_s16 = smov %s1578_s21  ;;  %23 = sbr.rel (!%p21_p12) target bundleno = 6 (0x6), region = 108 }
 0x2b7   :  { %1116 = vsyncpa [#allocation3], 1 }
 0x2b8   :  { %1118 = vsyncpa [#allocation3 + $0x1], 1 }
 0x2b9   :  { %1119 = vsyncpa [#allocation5], 1 }

</bundles_post_ra>
